<compile_context>
chip_gen: v7x
topology: tpu7x:2x2x1
jax: 0.10.0
libtpu: 0.0.40
codegen_flags: <defaults>
</compile_context>

<pallas_src>
import functools

import jax
import jax.numpy as jnp
from jax import lax
from jax.experimental import pallas as pl
from jax.experimental.pallas import tpu as pltpu


def _align8(n):
    return ((n + 7) // 8) * 8


def _rnn_seq_kernel(
    n_layers, input_size, hidden, output_size, offs, layer_stride,
    # inputs
    x_ref,      # (T, input_size)            whole sequence, VMEM resident
    dr_ref,     # (T, output_size)           whole sequence, VMEM resident
    h0_ref,     # (n_layers, hidden)         initial hidden state
    slab_ref,   # (R, max(hidden, out))      packed weight slab (one DMA)
    # outputs
    out_ref,    # (T, output_size)           per-step outputs
    h_ref,      # (n_layers, hidden)         final hidden state (used as carry)
):
    H = hidden
    T = x_ref.shape[0]

    # Hidden-state carry lives in the (resident) output ref; seed it once.
    h_ref[...] = h0_ref[...]

    def step(t, carry):
        x_t = x_ref[pl.ds(t, 1), :]                                   # (1, input_size)

        # encoded = i2h(x_t) + b_i2h
        wi2h = slab_ref[offs["wi2h"]:offs["wi2h"] + input_size, :H]
        bi2h = slab_ref[offs["bi2h"]:offs["bi2h"] + 1, :H]
        x_l = jnp.dot(x_t, wi2h, preferred_element_type=jnp.float32) + bi2h

        # Stacked ReLU-RNN layers (layers unrolled; seq handled by fori_loop).
        for layer in range(n_layers):
            r_ih = offs["wih"] + layer * layer_stride
            r_hh = offs["whh"] + layer * layer_stride
            wih_l = slab_ref[r_ih:r_ih + H, :H]
            whh_l = slab_ref[r_hh:r_hh + H, :H]
            b_l = slab_ref[offs["b"] + layer:offs["b"] + layer + 1, :H]   # b_ih + b_hh
            h_prev = h_ref[layer:layer + 1, :]                            # (1, H)
            pre = (
                jnp.dot(x_l, wih_l, preferred_element_type=jnp.float32)
                + jnp.dot(h_prev, whh_l, preferred_element_type=jnp.float32)
                + b_l
            )
            h_new = jnp.maximum(pre, 0.0)                                 # ReLU
            h_ref[layer:layer + 1, :] = h_new    # per-layer store (idle vst slot)
            x_l = h_new                          # feeds next layer

        # h2o + numerically stable softmax (exact reciprocal) + late-fusion add.
        wh2o = slab_ref[offs["wh2o"]:offs["wh2o"] + H, :output_size]
        bh2o = slab_ref[offs["bh2o"]:offs["bh2o"] + 1, :output_size]
        logits = jnp.dot(x_l, wh2o, preferred_element_type=jnp.float32) + bh2o
        m = jnp.max(logits, axis=-1, keepdims=True)
        e = jnp.exp(logits - m)
        sm = e / jnp.sum(e, axis=-1, keepdims=True)
        out_ref[pl.ds(t, 1), :] = sm + dr_ref[pl.ds(t, 1), :]
        return carry

    lax.fori_loop(0, T, step, 0)


def pack_params(params, *, n_layers):
    """Pack all static weights into ONE contiguous f32 slab (one DMA per call).

    Each segment starts at an 8-aligned row so in-kernel slices are
    sublane-aligned views.  Weights are stored transposed relative to PyTorch,
    i.e. (in_features, out_features), so the kernel computes y = x @ W + b.
    """
    wi2h = params["wi2h"]                 # (input_size, H)
    input_size, H = wi2h.shape
    output_size = params["wh2o"].shape[1]
    Hs = _align8(H)                       # per-layer row stride inside the slab
    cols = max(H, output_size)

    offs = {}
    r = 0

    def seg(name, nrows):
        nonlocal r
        offs[name] = r
        r = _align8(r + nrows)

    seg("wi2h", input_size)
    seg("bi2h", 1)
    seg("wih", n_layers * Hs)
    seg("whh", n_layers * Hs)
    seg("b", n_layers)
    seg("wh2o", H)
    seg("bh2o", 1)

    slab = jnp.zeros((r, cols), jnp.float32)
    slab = slab.at[offs["wi2h"]:offs["wi2h"] + input_size, :H].set(wi2h)
    slab = slab.at[offs["bi2h"], :H].set(params["bi2h"][0])
    for l in range(n_layers):
        slab = slab.at[offs["wih"] + l * Hs:offs["wih"] + l * Hs + H, :H].set(
            params["wih"][l])
        slab = slab.at[offs["whh"] + l * Hs:offs["whh"] + l * Hs + H, :H].set(
            params["whh"][l])
    b_sum = (params["bih"] + params["bhh"]).reshape(n_layers, H)
    slab = slab.at[offs["b"]:offs["b"] + n_layers, :H].set(b_sum)
    slab = slab.at[offs["wh2o"]:offs["wh2o"] + H, :output_size].set(params["wh2o"])
    slab = slab.at[offs["bh2o"], :output_size].set(params["bh2o"][0])

    return {
        "slab": slab,
        "offs": offs,
        "layer_stride": Hs,
        "dims": (input_size, H, output_size),
    }


def rnn_module_forward_seq(x_seq, h0, dr_seq, packed, *, n_layers):
    """Fused T-step RNNModule forward (one pallas_call for the whole sequence).

    Args:
      x_seq:  (T, input_size) float32  -- per-step inputs (batch=1 per step)
      h0:     (n_layers, 1, hidden) float32
      dr_seq: (T, output_size) float32 -- per-step dr_data
      packed: output of pack_params()
    Returns:
      (out_seq, hidden_final): ((T, output_size), (n_layers, 1, hidden))
    """
    input_size, hidden, output_size = packed["dims"]
    T = x_seq.shape[0]

    kernel = functools.partial(
        _rnn_seq_kernel, n_layers, input_size, hidden, output_size,
        packed["offs"], packed["layer_stride"])

    vmem = pl.BlockSpec(memory_space=pltpu.MemorySpace.VMEM)

    out_seq, h_new = pl.pallas_call(
        kernel,
        out_shape=(
            jax.ShapeDtypeStruct((T, output_size), jnp.float32),
            jax.ShapeDtypeStruct((n_layers, hidden), jnp.float32),
        ),
        in_specs=[vmem, vmem, vmem, vmem],
        out_specs=(vmem, vmem),
    )(x_seq, dr_seq, h0.reshape(n_layers, hidden), packed["slab"])

    return out_seq, h_new.reshape(n_layers, 1, hidden)


def rnn_module_forward(x, hidden, dr_data, packed, *, n_layers):
    """Exact single-step RNNModule.forward(input, hidden, dr_data) semantics."""
    out, h_new = rnn_module_forward_seq(x, hidden, dr_data, packed,
                                        n_layers=n_layers)
    return out, h_new


def _init_params(key, input_size, hidden_size, output_size, n_layers):
    """Deterministic synthetic parameters (PyTorch-like uniform ranges).

    Stored transposed relative to PyTorch: (in_features, out_features).
    """
    ks = jax.random.split(key, 8)

    def unif(k, shape, fan_in):
        bound = 1.0 / jnp.sqrt(jnp.float32(fan_in))
        return jax.random.uniform(k, shape, jnp.float32, -bound, bound)

    return {
        "wi2h": unif(ks[0], (input_size, hidden_size), input_size),
        "bi2h": unif(ks[1], (1, hidden_size), input_size),
        "wih": unif(ks[2], (n_layers, hidden_size, hidden_size), hidden_size),
        "bih": unif(ks[3], (n_layers, 1, hidden_size), hidden_size),
        "whh": unif(ks[4], (n_layers, hidden_size, hidden_size), hidden_size),
        "bhh": unif(ks[5], (n_layers, 1, hidden_size), hidden_size),
        "wh2o": unif(ks[6], (hidden_size, output_size), hidden_size),
        "bh2o": unif(ks[7], (1, output_size), hidden_size),
    }


if __name__ == "__main__":
    input_size = 16
    hidden_size = 32
    output_size = 8
    n_layers = 2
    seq_len = 8   # number of per-timestep forward() calls fused into one kernel

    key = jax.random.PRNGKey(0)
    k_x, k_h, k_dr, k_p = jax.random.split(key, 4)

    x_seq = jax.random.normal(k_x, (seq_len, input_size), jnp.float32)
    # init_hidden() returns zeros for model='rnn'; use non-zero hidden so the
    # recurrent (h @ whh) path is actually exercised by the check.
    h0 = jax.random.normal(k_h, (n_layers, 1, hidden_size), jnp.float32)
    dr_seq = jax.random.normal(k_dr, (seq_len, output_size), jnp.float32)

    params = _init_params(k_p, input_size, hidden_size, output_size, n_layers)
    packed = pack_params(params, n_layers=n_layers)

    # Fused multi-step kernel (the high-value path: weights DMA'd once).
    out_seq, h_final = rnn_module_forward_seq(
        x_seq, h0, dr_seq, packed, n_layers=n_layers)
    jax.block_until_ready((out_seq, h_final))

    # Single-step path (exact RNNModule.forward signature) = T == 1.
    out1, h1 = rnn_module_forward(
        x_seq[0:1], h0, dr_seq[0:1], packed, n_layers=n_layers)
    jax.block_until_ready((out1, h1))

    # Pure-JAX reference: T sequential single-step forwards.
    def ref_step(x, h, dr):
        enc = x @ params["wi2h"] + params["bi2h"]
        x_l = enc
        h_new = []
        for l in range(n_layers):
            pre = (x_l @ params["wih"][l] + params["bih"][l]
                   + h[l] @ params["whh"][l] + params["bhh"][l])
            x_l = jnp.maximum(pre, 0.0)
            h_new.append(x_l)
        logits = x_l @ params["wh2o"] + params["bh2o"]
        out = jax.nn.softmax(logits, axis=-1) + dr
        return out, jnp.stack(h_new, axis=0)

    h_ref = h0
    outs_ref = []
    for t in range(seq_len):
        o, h_ref = ref_step(x_seq[t:t + 1], h_ref, dr_seq[t:t + 1])
        outs_ref.append(o)
    out_ref_seq = jnp.concatenate(outs_ref, axis=0)

    assert jnp.allclose(h_final, h_ref, atol=1e-4), "hidden mismatch (seq)"
    assert jnp.allclose(out_seq, out_ref_seq, atol=1e-5), "output mismatch (seq)"

    o_ref1, h_ref1 = ref_step(x_seq[0:1], h0, dr_seq[0:1])
    assert jnp.allclose(h1, h_ref1, atol=1e-4), "hidden mismatch (single step)"
    assert jnp.allclose(out1, o_ref1, atol=1e-5), "output mismatch (single step)"

    print("KERNEL_OK")
</pallas_src>

<mosaic_0001>
module attributes {stable_mosaic.version = 11 : i64} {
  func.func @_rnn_seq_kernel(%arg0: memref<8x16xf32, #tpu.memory_space<vmem>>, %arg1: memref<8x8xf32, #tpu.memory_space<vmem>>, %arg2: memref<2x32xf32, #tpu.memory_space<vmem>>, %arg3: memref<200x32xf32, #tpu.memory_space<vmem>>, %arg4: memref<8x8xf32, #tpu.memory_space<vmem>>, %arg5: memref<2x32xf32, #tpu.memory_space<vmem>>) attributes {dimension_semantics = [], scalar_prefetch = 0 : i64, scratch_operands = 0 : i64, tpu.core_type = #tpu.core_type<tc>} {
    %c0 = arith.constant 0 : index
    %c0_0 = arith.constant 0 : index
    %0 = vector.load %arg2[%c0, %c0_0] : memref<2x32xf32, #tpu.memory_space<vmem>>, vector<2x32xf32>
    %c0_1 = arith.constant 0 : index
    %c0_2 = arith.constant 0 : index
    %1 = vector.load %arg5[%c0_1, %c0_2] : memref<2x32xf32, #tpu.memory_space<vmem>>, vector<2x32xf32>
    tpu.vector_store %arg5[%c0_1, %c0_2], %0 {strides = array<i32>} : memref<2x32xf32, #tpu.memory_space<vmem>>, vector<2x32xf32>,
    %c0_i32 = arith.constant 0 : i32
    %c8_i32 = arith.constant 8 : i32
    %2 = arith.addi %c0_i32, %c8_i32 : i32
    %c1_i32 = arith.constant 1 : i32
    scf.for %arg6 = %c0_i32 to %2 step %c1_i32  : i32 {
      %3 = arith.index_cast %arg6 : i32 to index
      %c0_4 = arith.constant 0 : index
      %4 = vector.load %arg0[%3, %c0_4] : memref<8x16xf32, #tpu.memory_space<vmem>>, vector<1x16xf32>
      %c0_5 = arith.constant 0 : index
      %c0_6 = arith.constant 0 : index
      %5 = vector.load %arg3[%c0_5, %c0_6] : memref<200x32xf32, #tpu.memory_space<vmem>>, vector<16x32xf32>
      %c16 = arith.constant 16 : index
      %c0_7 = arith.constant 0 : index
      %6 = vector.load %arg3[%c16, %c0_7] : memref<200x32xf32, #tpu.memory_space<vmem>>, vector<1x32xf32>
      %cst = arith.constant dense<0.000000e+00> : vector<1x32xf32>
      %7 = tpu.matmul %4, %5, %cst {dimension_numbers = #tpu.dot_dimension_numbers<[1], [0], [0], [1], [0, 0, 1, 1], [], []>} : vector<1x16xf32>, vector<16x32xf32>, vector<1x32xf32> -> vector<1x32xf32>
      %8 = arith.addf %7, %6 : vector<1x32xf32>
      %c24 = arith.constant 24 : index
      %c0_8 = arith.constant 0 : index
      %9 = vector.load %arg3[%c24, %c0_8] : memref<200x32xf32, #tpu.memory_space<vmem>>, vector<32x32xf32>
      %c88 = arith.constant 88 : index
      %c0_9 = arith.constant 0 : index
      %10 = vector.load %arg3[%c88, %c0_9] : memref<200x32xf32, #tpu.memory_space<vmem>>, vector<32x32xf32>
      %c152 = arith.constant 152 : index
      %c0_10 = arith.constant 0 : index
      %11 = vector.load %arg3[%c152, %c0_10] : memref<200x32xf32, #tpu.memory_space<vmem>>, vector<1x32xf32>
      %c0_11 = arith.constant 0 : index
      %c0_12 = arith.constant 0 : index
      %12 = vector.load %arg5[%c0_11, %c0_12] : memref<2x32xf32, #tpu.memory_space<vmem>>, vector<1x32xf32>
      %cst_13 = arith.constant dense<0.000000e+00> : vector<1x32xf32>
      %13 = tpu.matmul %8, %9, %cst_13 {dimension_numbers = #tpu.dot_dimension_numbers<[1], [0], [0], [1], [0, 0, 1, 1], [], []>} : vector<1x32xf32>, vector<32x32xf32>, vector<1x32xf32> -> vector<1x32xf32>
      %cst_14 = arith.constant dense<0.000000e+00> : vector<1x32xf32>
      %14 = tpu.matmul %12, %10, %cst_14 {dimension_numbers = #tpu.dot_dimension_numbers<[1], [0], [0], [1], [0, 0, 1, 1], [], []>} : vector<1x32xf32>, vector<32x32xf32>, vector<1x32xf32> -> vector<1x32xf32>
      %15 = arith.addf %13, %14 : vector<1x32xf32>
      %16 = arith.addf %15, %11 : vector<1x32xf32>
      %cst_15 = arith.constant 0.000000e+00 : f32
      %17 = vector.broadcast %cst_15 : f32 to vector<1x32xf32>
      %18 = arith.maximumf %16, %17 : vector<1x32xf32>
      %c0_16 = arith.constant 0 : index
      %c0_17 = arith.constant 0 : index
      %19 = vector.load %arg5[%c0_16, %c0_17] : memref<2x32xf32, #tpu.memory_space<vmem>>, vector<1x32xf32>
      tpu.vector_store %arg5[%c0_16, %c0_17], %18 {strides = array<i32>} : memref<2x32xf32, #tpu.memory_space<vmem>>, vector<1x32xf32>,
      %c56 = arith.constant 56 : index
      %c0_18 = arith.constant 0 : index
      %20 = vector.load %arg3[%c56, %c0_18] : memref<200x32xf32, #tpu.memory_space<vmem>>, vector<32x32xf32>
      %c120 = arith.constant 120 : index
      %c0_19 = arith.constant 0 : index
      %21 = vector.load %arg3[%c120, %c0_19] : memref<200x32xf32, #tpu.memory_space<vmem>>, vector<32x32xf32>
      %c153 = arith.constant 153 : index
      %c0_20 = arith.constant 0 : index
      %22 = vector.load %arg3[%c153, %c0_20] : memref<200x32xf32, #tpu.memory_space<vmem>>, vector<1x32xf32>
      %c1 = arith.constant 1 : index
      %c0_21 = arith.constant 0 : index
      %23 = vector.load %arg5[%c1, %c0_21] : memref<2x32xf32, #tpu.memory_space<vmem>>, vector<1x32xf32>
      %cst_22 = arith.constant dense<0.000000e+00> : vector<1x32xf32>
      %24 = tpu.matmul %18, %20, %cst_22 {dimension_numbers = #tpu.dot_dimension_numbers<[1], [0], [0], [1], [0, 0, 1, 1], [], []>} : vector<1x32xf32>, vector<32x32xf32>, vector<1x32xf32> -> vector<1x32xf32>
      %cst_23 = arith.constant dense<0.000000e+00> : vector<1x32xf32>
      %25 = tpu.matmul %23, %21, %cst_23 {dimension_numbers = #tpu.dot_dimension_numbers<[1], [0], [0], [1], [0, 0, 1, 1], [], []>} : vector<1x32xf32>, vector<32x32xf32>, vector<1x32xf32> -> vector<1x32xf32>
      %26 = arith.addf %24, %25 : vector<1x32xf32>
      %27 = arith.addf %26, %22 : vector<1x32xf32>
      %cst_24 = arith.constant 0.000000e+00 : f32
      %28 = vector.broadcast %cst_24 : f32 to vector<1x32xf32>
      %29 = arith.maximumf %27, %28 : vector<1x32xf32>
      %c1_25 = arith.constant 1 : index
      %c0_26 = arith.constant 0 : index
      %30 = vector.load %arg5[%c1_25, %c0_26] : memref<2x32xf32, #tpu.memory_space<vmem>>, vector<1x32xf32>
      tpu.vector_store %arg5[%c1_25, %c0_26], %29 {strides = array<i32>} : memref<2x32xf32, #tpu.memory_space<vmem>>, vector<1x32xf32>,
      %c160 = arith.constant 160 : index
      %c0_27 = arith.constant 0 : index
      %31 = vector.load %arg3[%c160, %c0_27] : memref<200x32xf32, #tpu.memory_space<vmem>>, vector<32x8xf32>
      %c192 = arith.constant 192 : index
      %c0_28 = arith.constant 0 : index
      %32 = vector.load %arg3[%c192, %c0_28] : memref<200x32xf32, #tpu.memory_space<vmem>>, vector<1x8xf32>
      %cst_29 = arith.constant dense<0.000000e+00> : vector<1x8xf32>
      %33 = tpu.matmul %29, %31, %cst_29 {dimension_numbers = #tpu.dot_dimension_numbers<[1], [0], [0], [1], [0, 0, 1, 1], [], []>} : vector<1x32xf32>, vector<32x8xf32>, vector<1x8xf32> -> vector<1x8xf32>
      %34 = arith.addf %33, %32 : vector<1x8xf32>
      %cst_30 = arith.constant dense<0xFF800000> : vector<1xf32>
      %35 = vector.multi_reduction <maximumf>, %34, %cst_30 [1] : vector<1x8xf32> to vector<1xf32>
      %36 = vector.shape_cast %35 : vector<1xf32> to vector<1x1xf32>
      %37 = vector.broadcast %36 : vector<1x1xf32> to vector<1x8xf32>
      %38 = arith.subf %34, %37 : vector<1x8xf32>
      %39 = math.exp %38 : vector<1x8xf32>
      %cst_31 = arith.constant dense<0.000000e+00> : vector<1xf32>
      %40 = vector.multi_reduction <add>, %39, %cst_31 [1] : vector<1x8xf32> to vector<1xf32>
      %41 = vector.shape_cast %40 : vector<1xf32> to vector<1x1xf32>
      %42 = vector.broadcast %41 : vector<1x1xf32> to vector<1x8xf32>
      %43 = arith.divf %39, %42 : vector<1x8xf32>
      %44 = arith.index_cast %arg6 : i32 to index
      %c0_32 = arith.constant 0 : index
      %45 = vector.load %arg1[%44, %c0_32] : memref<8x8xf32, #tpu.memory_space<vmem>>, vector<1x8xf32>
      %46 = arith.addf %43, %45 : vector<1x8xf32>
      %47 = arith.index_cast %arg6 : i32 to index
      %c0_33 = arith.constant 0 : index
      %48 = vector.load %arg4[%47, %c0_33] : memref<8x8xf32, #tpu.memory_space<vmem>>, vector<1x8xf32>
      tpu.vector_store %arg4[%47, %c0_33], %46 {strides = array<i32>} : memref<8x8xf32, #tpu.memory_space<vmem>>, vector<1x8xf32>,
    }
    %c8_i32_3 = arith.constant 8 : i32
    return
  }
}

</mosaic_0001>

<bundles_post_ra>
// kernel: tpu_custom_call.1
= control target key start
LH: loop header
LB: loop body
LE: loop exit
PB: predicated region body
PF: predicated region fallthrough
CT: control target
= control target key end

     0   :  { %11 = vsyncpa [#allocation3], 0  ;;  %s952_s0 = inlined_call_operand.vmem [shape: f32[8,16], index: 0, kind: input, shape index: {}]   ;;  %s953_s1 = inlined_call_operand.vmem [shape: f32[8,8], index: 1, kind: input, shape index: {}]   ;;  %s954_s2 = inlined_call_operand.vmem [shape: f32[2,32], index: 2, kind: input, shape index: {}]   ;;  %s955_s3 = inlined_call_operand.vmem [shape: f32[200,32], index: 3, kind: input, shape index: {}]   ;;  %s956_s4 = inlined_call_operand.hbm [shape: f32[8,8], index: 4, kind: output, shape index: {0}]   ;;  %s957_s5 = inlined_call_operand.hbm [shape: f32[2,32], index: 5, kind: output, shape index: {1}]  }
   0x1   :  { %12 = vsyncpa [#allocation5], 0  ;;  %v21_v0 = vld [vmem:[%s954_s2] sm:$0x3]  ;;  %vm22_vm0 = vcmask 254976   ;;  %s800_s20 = smov 0  }
   0x2   :  { %23 = vst.msk [vmem:[#allocation4] sm:$0x3] %vm22_vm0, %v21_v0 }
   0x3 LB: > { %v32_v1 = vld [vmem:[%s955_s3] sm:$0xff]  ;;  %v33_v2 = vld [vmem:[%s955_s3 + $0x8] sm:$0xff]  ;;  %v762_v3 = vmov 0.0|0.0   ;;  %vm763_vm1 = vmmov 0   ;;  %v764_v5 = vmov 0.0   ;;  %v113_v6 = vld [vmem:[%s955_s3 + $0x58] sm:$0xff]  ;;  %s30_s7 = scalar_lea.vmem %s952_s0, %s760_s20  ;;  %s519_s27 = scalar_lea.vmem %s953_s1, %s760_s20  ;;  %s760_s20 = sphi %s800_s20, %s29_s20  }
   0x4   : > { %656 = vmatprep.subr.bf16.mxu0 %v762_v3  ;;  %v657_v4 = vpack.c.bf16 %v33_v2, %v32_v1  ;;  %598 = vmatprep.mubr.msk.f32.mxu0 %vm763_vm1, %v764_v5  ;;  %v114_v7 = vld [vmem:[%s955_s3 + $0x60] sm:$0xff]  ;;  %v109_v8 = vld [vmem:[%s955_s3 + $0x18] sm:$0xff]  ;;  %v115_v11 = vld [vmem:[%s955_s3 + $0x68] sm:$0xff]  ;;  %vm35_vm2 = vcmask 130048   ;;  %vm119_vm3 = vcmask 261120   ;;  %vm268_vm4 = vcmask 253952  }
   0x5   : > { %659 = vmatprep.subr.bf16.mxu1 %v762_v3  ;;  %v660_v9 = vpack.c.bf16 %v114_v7, %v113_v6  ;;  %v110_v10 = vld [vmem:[%s955_s3 + $0x20] sm:$0xff]  ;;  %v116_v12 = vld [vmem:[%s955_s3 + $0x70] sm:$0xff]  ;;  %609 = vmatprep.mubr.msk.f32.mxu1 %vm763_vm1, %v764_v5  ;;  %v111_v16 = vld [vmem:[%s955_s3 + $0x28] sm:$0xff]  ;;  %vm507_vm5 = vcmask 57344   ;;  %s522_s28 = scalar_lea.vmem [#allocation2], %s760_s20  ;;  %s29_s20 = sadd.s32 1, %s760_s20  }
   0x6   : > { %658 = vmatpush3.bf16.msra.mxu0 %v657_v4  ;;  %v31_v13 = vld [vmem:[%s30_s7] sm:$0x1]  ;;  %v666_v14 = vpack.c.bf16 %v110_v10, %v109_v8  ;;  %v663_v15 = vpack.c.bf16 %v116_v12, %v115_v11  ;;  %v112_v17 = vld [vmem:[%s955_s3 + $0x30] sm:$0xff]  ;;  %v274_v20 = vld [vmem:[%s955_s3 + $0x78] sm:$0xff]  ;;  %p26_p0 = scmp.ge.s32.totalorder %s29_s20, 8  }
   0x7   : > { %661 = vmatpush3.bf16.msra.mxu1 %v660_v9  ;;  %665 = vmatprep.subr.bf16.mxu0 %v762_v3  ;;  %v669_v18 = vpack.c.bf16 %v112_v17, %v111_v16  ;;  %v275_v21 = vld [vmem:[%s955_s3 + $0x80] sm:$0xff]  ;;  %v34_v23 = vld [vmem:[%s955_s3 + $0x10] sm:$0x1]  ;;  %v270_v27 = vld [vmem:[%s955_s3 + $0x38] sm:$0xff]  ;;  %s765_s29 = smov (%p26_p0), [#allocation2]   ;;  %s766_s6 = smov (%p26_p0), [#allocation4]  }
   0x8   : > { %662 = vmatprep.subr.bf16.mxu1 %v762_v3  ;;  %v672_v22 = vpack.c.bf16 %v275_v21, %v274_v20  ;;  %v271_v28 = vld [vmem:[%s955_s3 + $0x40] sm:$0xff]  ;;  %v276_v32 = vld [vmem:[%s955_s3 + $0x88] sm:$0xff]  ;;  %v277_v33 = vld [vmem:[%s955_s3 + $0x90] sm:$0xff]  ;;  %s530_s30 = sshll.u32 (%p26_p0), %s765_s29, 4  ;;  %s540_s7 = sshll.u32 (%p26_p0), %s766_s6, 4  ;;  %s531_s30 = int_to_ptr.vmem [resolvable:$true] %s530_s30  ;;  %s541_s7 = int_to_ptr.vmem [resolvable:$true] %s540_s7 }
   0x9   : > { %599 = vmatmul.mubr.msk.f32.vlgmr.msra.gmra.mrb[0].mxu0 %vm35_vm2, %v31_v13  ;;  %v118_v19 = vld [vmem:[#allocation4] sm:$0x1]  ;;  %v678_v29 = vpack.c.bf16 %v271_v28, %v270_v27  ;;  %v675_v34 = vpack.c.bf16 %v277_v33, %v276_v32  ;;  %v273_v36 = vld [vmem:[%s955_s3 + $0x50] sm:$0xff]  ;;  %v279_v38 = vld [vmem:[#allocation4 + $0x1] sm:$0x1]  ;;  %s706_s8 = scalar_lea.vmem (%p26_p0), %s531_s30, 128  ;;  %p711_p2 = scmp.lt.s32.totalorder (%p26_p0), %s531_s30, %s531_s30 }
   0xa   : > { %667 = vmatpush3.bf16.msra.mxu0 %v666_v14  ;;  %620 = vmatprep.mubr.msk.f32.mxu0 %vm763_vm1, %v764_v5  ;;  %v272_v35 = vld [vmem:[%s955_s3 + $0x48] sm:$0xff]  ;;  %v117_v39 = vld [vmem:[%s955_s3 + $0x98] sm:$0x1]  ;;  %v429_v45 = vld [vmem:[%s955_s3 + $0xa0] sm:$0xff]  ;;  %p707_p1 = scmp.ne.s32.totalorder (%p26_p0), %s531_s30, %s706_s8  ;;  %p712_p3 = scmp.lt.s32.totalorder (%p26_p0), %s706_s8, %s706_s8 }
   0xb   : > { %664 = vmatpush3.bf16.msra.mxu1 %v663_v15  ;;  %668 = vmatprep.subr.bf16.mxu0 %v762_v3  ;;  %v681_v37 = vpack.c.bf16 %v273_v36, %v272_v35  ;;  %v430_v46 = vld [vmem:[%s955_s3 + $0xa8] sm:$0xff]  ;;  %v431_v50 = vld [vmem:[%s955_s3 + $0xb0] sm:$0xff]  ;;  %v432_v51 = vld [vmem:[%s955_s3 + $0xb8] sm:$0xff] }
   0xc   : > { %671 = vmatprep.subr.bf16.mxu1 %v762_v3  ;;  %v684_v47 = vpack.c.bf16 %v430_v46, %v429_v45  ;;  %v687_v52 = vpack.c.bf16 %v432_v51, %v431_v50  ;;  %v278_v53 = vld [vmem:[%s955_s3 + $0x99] sm:$0x1]  ;;  %v433_v59 = vld [vmem:[%s955_s3 + $0xc0] sm:$0x1]  ;;  %p713_p4 = por (%p26_p0), %p712_p3, %p711_p2 }
   0xd   : > { %v520_v7 = vld [vmem:[%s519_s27] sm:$0x1] }
   0xe   : > { %670 = vmatpush3.bf16.msra.mxu0 %v669_v18  ;;  %610 = vmatmul.mubr.msk.f32.vlgmr.msra.gmra.mrb[0].mxu1 %vm119_vm3, %v118_v19  ;;  %p714_p5 = pnand (%p26_p0), %p713_p4, %p707_p1 }
   0xf   : > { %677 = vmatprep.subr.bf16.mxu0 %v762_v3  ;;  %631 = vmatprep.mubr.msk.f32.mxu1 %vm763_vm1, %v764_v5 }
  0x10   : > { %673 = vmatpush3.bf16.msra.mxu1 %v672_v22 }
  0x11   : > { %674 = vmatprep.subr.bf16.mxu1 %v762_v3 }
  0x14   : > { %676 = vmatpush3.bf16.msra.mxu1 %v675_v34 }
  0x15   : > { %683 = vmatprep.subr.bf16.mxu1 %v762_v3 }
  0x17   : > { %632 = vmatmul.mubr.msk.f32.vlgmr.msra.gmra.mrb[2].mxu1 %vm119_vm3, %v279_v38 }
  0x18   : > { %653 = vmatprep.mubr.msk.f32.mxu1 %vm763_vm1, %v764_v5  ;;  %685 = vmatpush3.bf16.msra.mxu1 %v684_v47 }
  0x19   : > { %686 = vmatprep.subr.bf16.mxu1 %v762_v3 }
  0x1c   : > { %688 = vmatpush3.bf16.msra.mxu1 %v687_v52 }
  0xdc   : > { %v105_v24 = vpop.f32.mrb[0].mxu0 }
  0xdd   : > { %v106_v25 = vadd.f32 %v105_v24, %v34_v23  ;;  %v600_v26 = vpop.f32.mrb[1].mxu0 }
  0xdf   : > { %621 = vmatmul.mubr.msk.f32.vlgmr.msra.gmra.mrb[2].mxu0 %vm119_vm3, %v106_v25 }
  0xe0   : > { %642 = vmatprep.mubr.msk.f32.mxu0 %vm763_vm1, %v764_v5  ;;  %679 = vmatpush3.bf16.msra.mxu0 %v678_v29 }
  0xe1   : > { %v189_v30 = vpop.f32.mrb[0].mxu1  ;;  %680 = vmatprep.subr.bf16.mxu0 %v762_v3 }
  0xe2   : > { %v611_v31 = vpop.f32.mrb[1].mxu1 }
  0xe4   : > { %682 = vmatpush3.bf16.msra.mxu0 %v681_v37 }
  0xea   : > { %v349_v48 = vpop.f32.mrb[2].mxu1 }
  0xeb   : > { %v633_v49 = vpop.f32.mrb[3].mxu1 }
 0x1b2   : > { %v262_v40 = vpop.f32.mrb[2].mxu0 }
 0x1b3   : > { %v263_v41 = vadd.f32 %v262_v40, %v189_v30  ;;  %v622_v42 = vpop.f32.mrb[3].mxu0 }
 0x1b5   : > { %v266_v43 = vadd.f32 %v263_v41, %v117_v39 }
 0x1b7   : > { %v267_v44 = vmax.f32 %v266_v43, 0.0 }
 0x1b9   : > { %269 = vst.msk [vmem:[#allocation4] sm:$0x1] %vm268_vm4, %v267_v44  ;;  %643 = vmatmul.mubr.msk.f32.vlgmr.msra.gmra.mrb[4].mxu0 %vm119_vm3, %v267_v44 }
 0x28c   : > { %v422_v54 = vpop.f32.mrb[4].mxu0 }
 0x28d   : > { %v423_v55 = vadd.f32 %v422_v54, %v349_v48  ;;  %v644_v56 = vpop.f32.mrb[5].mxu0 }
 0x28f   : > { %v426_v57 = vadd.f32 %v423_v55, %v278_v53 }
 0x291   : > { %v427_v58 = vmax.f32 %v426_v57, 0.0 }
 0x293   : > { %428 = vst.msk [vmem:[#allocation4 + $0x1] sm:$0x1] %vm268_vm4, %v427_v58  ;;  %654 = vmatmul.mubr.msk.f32.vlgmr.msra.gmra.mrb[4].mxu1 %vm119_vm3, %v427_v58 }
 0x366   : > { %v503_v60 = vpop.f32.mrb[4].mxu1 }
 0x367   : > { %v504_v61 = vadd.f32 %v503_v60, %v433_v59  ;;  %v655_v62 = vpop.f32.mrb[5].mxu1 }
 0x369   : > { %v508_v63 = vsel %vm507_vm5, %v504_v61, -inf }
 0x36a   : > { %509 = vmax.xlane.f32.xlu0 %v508_v63 }
 0x3f7   : > { %v510_v0 = vpop.xlane.xlu0 %509 }
 0x3f8   : > { %v511_v1 = vsub.f32 %v504_v61, %v510_v0 }
 0x3fa   : > { %v512_v2 = vmul.f32 1.442695, %v511_v1 }
 0x3fc   : > { %702 = vpow2.f32 %v512_v2 }
 0x406   : > { %v703_v3 = vpop.eup %702 }
 0x407   : > { %v514_v4 = vsel %vm507_vm5, %v703_v3, 0.0 }
 0x408   : > { %515 = vadd.xlane.f32.xlu0 %v514_v4 }
 0x495   : > { %v516_v5 = vpop.xlane.xlu0 %515 }
 0x496   : > { %704 = vrcp.f32 %v516_v5 }
 0x49f   :  { %28 = sbr.rel (!%p26_p0) target bundleno = 3 (0x3), region = 54 }
 0x4a0   : > { %v705_v6 = vpop.eup %704 }
 0x4a1   : > { %v518_v8 = vmul.f32 %v705_v6, %v703_v3 }
 0x4a3   : > { %v521_v9 = vadd.f32 %v520_v7, %v518_v8 }
 0x4a5   : > { %523 = vst.msk [vmem:[%s522_s28] sm:$0x1] %vm507_vm5, %v521_v9 }
 0x4a6   :  { %717 = shalt.err (!%p714_p5)
}
 0x4a7   :  { %s718_s11 = scalar_lea.hbm %s956_s4, 128 }
 0x4a8   :  { %p719_p6 = scmp.ne.s32.totalorder %s956_s4, %s718_s11  ;;  %p722_p7 = scmp.lt.u32.totalorder %s718_s11, %s956_s4 }
 0x4aa   :  { %p724_p8 = pnand %p722_p7, %p719_p6 }
 0x4ac   :  { %727 = shalt.err (!%p724_p8)
}
 0x4ad   :  { %533 = dma.vmem_to_hbm [thread:$0]  %s531_s30, 128, %s956_s4, [#allocation3]  }
 0x4ae   :  { %s728_s14 = scalar_lea.vmem %s541_s7, 32  ;;  %p733_p10 = scmp.lt.s32.totalorder %s541_s7, %s541_s7 }
 0x4af   :  { %p729_p9 = scmp.ne.s32.totalorder %s541_s7, %s728_s14  ;;  %p734_p11 = scmp.lt.s32.totalorder %s728_s14, %s728_s14 }
 0x4b1   :  { %p735_p12 = por %p734_p11, %p733_p10 }
 0x4b3   :  { %p736_p13 = pnand %p735_p12, %p729_p9 }
 0x4b5   :  { %739 = shalt.err (!%p736_p13)
}
 0x4b6   :  { %s740_s17 = scalar_lea.hbm %s957_s5, 32 }
 0x4b7   :  { %p741_p0 = scmp.ne.s32.totalorder %s957_s5, %s740_s17  ;;  %p744_p1 = scmp.lt.u32.totalorder %s740_s17, %s957_s5 }
 0x4b9   :  { %p746_p2 = pnand %p744_p1, %p741_p0 }
 0x4bb   :  { %749 = shalt.err (!%p746_p2)
}
 0x4bc   :  { %543 = dma.vmem_to_hbm [thread:$0]  %s541_s7, 32, %s957_s5, [#allocation5]  }
 0x4bd   :  { %754 = dma.done.wait [#allocation3], 128  }
 0x4be   :  { %755 = vsyncadd [#allocation3], 4294967168 }
 0x4bf   :  { %756 = dma.done.wait [#allocation5], 32  }
 0x4c0   :  { %757 = vsyncadd [#allocation5], 4294967264 }
 0x4c1   :  { %550 = vsyncpa [#allocation3], 1 }
 0x4c2   :  { %551 = vsyncpa [#allocation5], 1 }

</bundles_post_ra>
